<compile_context>
chip_gen: v7x
topology: tpu7x:2x2x1
jax: 0.10.0
libtpu: 0.0.40
codegen_flags: <defaults>
</compile_context>

<pallas_src>
import functools

import jax
import jax.numpy as jnp
from jax.experimental import pallas as pl
from jax.experimental.pallas import tpu as pltpu


def _pool_kernel(x_ref, o_ref, *, w: int, wo: int, k: int):
    """x_ref: (tm, k*2*w) wide-lane block; o_ref: (tm, k*wo).

    Each kernel row holds k strips; one strip = [top image row (w lanes),
    bottom image row (w lanes)] of one (n, c, ho) pooled output row.
    """
    L = k * 2 * w
    lane_axis = len(x_ref.shape) - 1          # pltpu.roll needs a non-negative axis
    x = x_ref[...]

    # Vertical (H) pair max: rolled[j] = x[j + w], so every lane j with
    # (j % 2w) < w now holds max(top, bottom) of the same image column.
    m = jnp.maximum(x, pltpu.roll(x, shift=L - w, axis=lane_axis))
    # Horizontal (W) pair max: rolled[j] = m[j + 1]; the full 2x2 window max now
    # sits at lanes  s*2w + 2*q  (q in [0, wo)) for strip s.
    m = jnp.maximum(m, pltpu.roll(m, shift=L - 1, axis=lane_axis))

    lane = jax.lax.broadcasted_iota(jnp.int32, m.shape, dimension=lane_axis)

    def compact(v, g0):
        # Invariant: every aligned group of size g has its wanted lanes in the
        # first g//2 positions.  Each step merges adjacent groups by pulling the
        # right group's front half left by g//2.  log2(L/g0) roll+select steps
        # (XLU/VPU filler; this kernel is DMA-bound).
        g = g0
        while g < L:
            s = g // 2
            shifted = pltpu.roll(v, shift=L - s, axis=lane_axis)   # shifted[j] = v[j+s]
            take = (lane % (2 * g)) >= s
            v = jnp.where(take, shifted, v)
            g *= 2
        return v

    # Stage A: pack even lanes to the front (element at lane 2t -> lane t).
    # Window maxima move from  s*2w + 2q  to  s*2*wo + q.
    m = compact(m, 2)
    # Stage B: keep the first wo lanes of every 2*wo group and pack to the front:
    # s*2*wo + q  ->  s*wo + q.  The first k*wo lanes now hold the k strips'
    # pooled rows in exact NCHW output order.
    m = compact(m, 2 * wo)

    o_ref[...] = m[:, : k * wo]


def _is_pow2(n: int) -> bool:
    return n > 0 and (n & (n - 1)) == 0


def _choose_fold(R: int, W: int, Wo: int, *, max_lanes: int = 8192,
                 target_lanes: int = 512) -> int:
    """k = number of 2-row strips folded into the lane dim (power of two dividing R).

    Prefer the smallest k giving >= target_lanes input lanes and a 128-multiple
    output lane width (unmasked stores); otherwise the widest fold under max_lanes.
    """
    cands = []
    k = 1
    while k <= R and R % k == 0:
        cands.append(k)
        k *= 2
    good = [d for d in cands
            if d * 2 * W >= target_lanes and (d * Wo) % 128 == 0 and d * 2 * W <= max_lanes]
    if good:
        return min(good)
    capped = [d for d in cands if d * 2 * W <= max_lanes]
    return max(capped) if capped else 1


def _pick_tile_rows(rows: int, fits) -> int:
    """Largest legal row tile (multiple of 8 or the full extent) fitting the VMEM
    budget; prefer an even (>=2) step count for v7x's two TensorCores, but never
    split a tiny problem below one full-sublane block (single step is cheapest on
    single-TC v5e/v6e)."""
    divs = [d for d in range(1, rows + 1) if rows % d == 0 and (d % 8 == 0 or d == rows)]
    ok = [d for d in divs if fits(d)] or [min(divs)]
    even = [d for d in ok if (rows // d) % 2 == 0 and d >= 8]
    return max(even) if even else max(ok)


def maxpool2d_2x2(x_nchw, *, vmem_budget_bytes: int = 8 * 1024 * 1024):
    """MaxPool2d(kernel_size=(2, 2), stride 2) on an NCHW tensor (single HBM pass)."""
    N, C, H, W = x_nchw.shape
    assert H % 2 == 0 and W % 2 == 0, "MaxPool2d(2,2) kernel expects even H and W"
    assert _is_pow2(W), "lane compaction expects power-of-two W"
    # TODO(synk): non-power-of-two W needs the width padded to the next power of two
    # (with -inf) in the wrapper-side wide-lane layout before calling the kernel.

    Ho, Wo = H // 2, W // 2
    R = N * C * Ho                       # number of 2-row strips

    k = _choose_fold(R, W, Wo)           # strips folded into the lane dim
    rows = R // k
    L = k * 2 * W                        # input lanes per kernel row
    out_lanes = k * Wo                   # output lanes per kernel row

    itemsize = jnp.dtype(x_nchw.dtype).itemsize
    sub = max(8, 32 // itemsize)         # padded sublane multiple: 8 f32, 16 bf16, 32 i8
    lanes_in = 128 * pl.cdiv(L, 128)
    lanes_out = 128 * pl.cdiv(out_lanes, 128)

    def fits(tm):
        sl = sub * pl.cdiv(tm, sub)
        # double-buffered input block + double-buffered output block, padded
        return 2 * sl * (lanes_in + lanes_out) * itemsize <= vmem_budget_bytes

    tm = _pick_tile_rows(rows, fits)
    grid = (rows // tm,)

    xr = x_nchw.reshape(rows, L)         # free contiguous view (no HBM relayout)

    out = pl.pallas_call(
        functools.partial(_pool_kernel, w=W, wo=Wo, k=k),
        out_shape=jax.ShapeDtypeStruct((rows, out_lanes), x_nchw.dtype),
        grid=grid,
        in_specs=[pl.BlockSpec((tm, L), lambda i: (i, 0))],
        out_specs=pl.BlockSpec((tm, out_lanes), lambda i: (i, 0)),
        compiler_params=pltpu.CompilerParams(dimension_semantics=("parallel",)),
    )(xr)

    return out.reshape(N, C, Ho, Wo)     # free contiguous view


if __name__ == "__main__":
    key = jax.random.PRNGKey(0)
    x = jax.random.normal(key, (2, 4, 16, 16), dtype=jnp.float32)

    pool = jax.jit(maxpool2d_2x2)
    y = jax.block_until_ready(pool(x))

    # Reference: exact MaxPool2d(2, 2) semantics (non-overlapping 2x2 windows).
    ref = jnp.max(x.reshape(2, 4, 8, 2, 8, 2), axis=(3, 5))
    assert y.shape == (2, 4, 8, 8), y.shape
    assert y.dtype == x.dtype
    assert jnp.array_equal(y, ref), "Pallas maxpool mismatch vs reference"

    print("KERNEL_OK")
</pallas_src>

<mosaic_0001>
module attributes {stable_mosaic.version = 11 : i64} {
  func.func @_pool_kernel(%arg0: i32, %arg1: memref<4x512xf32, #tpu.memory_space<vmem>>, %arg2: memref<4x128xf32, #tpu.memory_space<vmem>>) attributes {dimension_semantics = [#tpu.dimension_semantics<parallel>], iteration_bounds = array<i64: 1>, scalar_prefetch = 0 : i64, scratch_operands = 0 : i64, tpu.core_type = #tpu.core_type<tc>, window_params = [{transform_indices = @transform_0, window_bounds = array<i64: 4, 512>}, {transform_indices = @transform_1, window_bounds = array<i64: 4, 128>}]} {
    %c0 = arith.constant 0 : index
    %c0_0 = arith.constant 0 : index
    %0 = vector.load %arg1[%c0, %c0_0] : memref<4x512xf32, #tpu.memory_space<vmem>>, vector<4x512xf32>
    %c496_i32 = arith.constant 496 : i32
    %1 = tpu.dynamic_rotate %0 by %c496_i32 dim 1 : vector<4x512xf32>, i32 -> vector<4x512xf32>
    %2 = arith.maximumf %0, %1 : vector<4x512xf32>
    %c511_i32 = arith.constant 511 : i32
    %3 = tpu.dynamic_rotate %2 by %c511_i32 dim 1 : vector<4x512xf32>, i32 -> vector<4x512xf32>
    %4 = arith.maximumf %2, %3 : vector<4x512xf32>
    %5 = tpu.iota {dimensions = array<i32: 1>} : vector<4x512xi32>
    %c511_i32_1 = arith.constant 511 : i32
    %6 = tpu.dynamic_rotate %4 by %c511_i32_1 dim 1 : vector<4x512xf32>, i32 -> vector<4x512xf32>
    %c4_i32 = arith.constant 4 : i32
    %c0_i32 = arith.constant 0 : i32
    %7 = arith.cmpi eq, %c4_i32, %c0_i32 : i32
    %c1_i32 = arith.constant 1 : i32
    %8 = arith.select %7, %c1_i32, %c4_i32 : i32
    %9 = vector.broadcast %8 : i32 to vector<4x512xi32>
    %10 = arith.remsi %5, %9 : vector<4x512xi32>
    %c0_i32_2 = arith.constant 0 : i32
    %11 = vector.broadcast %c0_i32_2 : i32 to vector<4x512xi32>
    %12 = arith.cmpi ne, %10, %11 : vector<4x512xi32>
    %c0_i32_3 = arith.constant 0 : i32
    %13 = vector.broadcast %c0_i32_3 : i32 to vector<4x512xi32>
    %14 = arith.cmpi slt, %10, %13 : vector<4x512xi32>
    %c0_i32_4 = arith.constant 0 : i32
    %15 = arith.cmpi slt, %8, %c0_i32_4 : i32
    %16 = vector.broadcast %15 : i1 to vector<4x512xi1>
    %17 = vector.broadcast %16 : vector<4x512xi1> to vector<4x512xi1>
    %18 = arith.xori %14, %17 : vector<4x512xi1>
    %19 = arith.andi %18, %12 : vector<4x512xi1>
    %20 = vector.broadcast %8 : i32 to vector<4x512xi32>
    %21 = arith.addi %10, %20 : vector<4x512xi32>
    %22 = arith.select %19, %21, %10 : vector<4x512xi1>, vector<4x512xi32>
    %c1_i32_5 = arith.constant 1 : i32
    %23 = vector.broadcast %c1_i32_5 : i32 to vector<4x512xi32>
    %24 = arith.cmpi sge, %22, %23 : vector<4x512xi32>
    %25 = arith.select %24, %6, %4 : vector<4x512xi1>, vector<4x512xf32>
    %c510_i32 = arith.constant 510 : i32
    %26 = tpu.dynamic_rotate %25 by %c510_i32 dim 1 : vector<4x512xf32>, i32 -> vector<4x512xf32>
    %c8_i32 = arith.constant 8 : i32
    %c0_i32_6 = arith.constant 0 : i32
    %27 = arith.cmpi eq, %c8_i32, %c0_i32_6 : i32
    %c1_i32_7 = arith.constant 1 : i32
    %28 = arith.select %27, %c1_i32_7, %c8_i32 : i32
    %29 = vector.broadcast %28 : i32 to vector<4x512xi32>
    %30 = arith.remsi %5, %29 : vector<4x512xi32>
    %c0_i32_8 = arith.constant 0 : i32
    %31 = vector.broadcast %c0_i32_8 : i32 to vector<4x512xi32>
    %32 = arith.cmpi ne, %30, %31 : vector<4x512xi32>
    %c0_i32_9 = arith.constant 0 : i32
    %33 = vector.broadcast %c0_i32_9 : i32 to vector<4x512xi32>
    %34 = arith.cmpi slt, %30, %33 : vector<4x512xi32>
    %c0_i32_10 = arith.constant 0 : i32
    %35 = arith.cmpi slt, %28, %c0_i32_10 : i32
    %36 = vector.broadcast %35 : i1 to vector<4x512xi1>
    %37 = vector.broadcast %36 : vector<4x512xi1> to vector<4x512xi1>
    %38 = arith.xori %34, %37 : vector<4x512xi1>
    %39 = arith.andi %38, %32 : vector<4x512xi1>
    %40 = vector.broadcast %28 : i32 to vector<4x512xi32>
    %41 = arith.addi %30, %40 : vector<4x512xi32>
    %42 = arith.select %39, %41, %30 : vector<4x512xi1>, vector<4x512xi32>
    %c2_i32 = arith.constant 2 : i32
    %43 = vector.broadcast %c2_i32 : i32 to vector<4x512xi32>
    %44 = arith.cmpi sge, %42, %43 : vector<4x512xi32>
    %45 = arith.select %44, %26, %25 : vector<4x512xi1>, vector<4x512xf32>
    %c508_i32 = arith.constant 508 : i32
    %46 = tpu.dynamic_rotate %45 by %c508_i32 dim 1 : vector<4x512xf32>, i32 -> vector<4x512xf32>
    %c16_i32 = arith.constant 16 : i32
    %c0_i32_11 = arith.constant 0 : i32
    %47 = arith.cmpi eq, %c16_i32, %c0_i32_11 : i32
    %c1_i32_12 = arith.constant 1 : i32
    %48 = arith.select %47, %c1_i32_12, %c16_i32 : i32
    %49 = vector.broadcast %48 : i32 to vector<4x512xi32>
    %50 = arith.remsi %5, %49 : vector<4x512xi32>
    %c0_i32_13 = arith.constant 0 : i32
    %51 = vector.broadcast %c0_i32_13 : i32 to vector<4x512xi32>
    %52 = arith.cmpi ne, %50, %51 : vector<4x512xi32>
    %c0_i32_14 = arith.constant 0 : i32
    %53 = vector.broadcast %c0_i32_14 : i32 to vector<4x512xi32>
    %54 = arith.cmpi slt, %50, %53 : vector<4x512xi32>
    %c0_i32_15 = arith.constant 0 : i32
    %55 = arith.cmpi slt, %48, %c0_i32_15 : i32
    %56 = vector.broadcast %55 : i1 to vector<4x512xi1>
    %57 = vector.broadcast %56 : vector<4x512xi1> to vector<4x512xi1>
    %58 = arith.xori %54, %57 : vector<4x512xi1>
    %59 = arith.andi %58, %52 : vector<4x512xi1>
    %60 = vector.broadcast %48 : i32 to vector<4x512xi32>
    %61 = arith.addi %50, %60 : vector<4x512xi32>
    %62 = arith.select %59, %61, %50 : vector<4x512xi1>, vector<4x512xi32>
    %c4_i32_16 = arith.constant 4 : i32
    %63 = vector.broadcast %c4_i32_16 : i32 to vector<4x512xi32>
    %64 = arith.cmpi sge, %62, %63 : vector<4x512xi32>
    %65 = arith.select %64, %46, %45 : vector<4x512xi1>, vector<4x512xf32>
    %c504_i32 = arith.constant 504 : i32
    %66 = tpu.dynamic_rotate %65 by %c504_i32 dim 1 : vector<4x512xf32>, i32 -> vector<4x512xf32>
    %c32_i32 = arith.constant 32 : i32
    %c0_i32_17 = arith.constant 0 : i32
    %67 = arith.cmpi eq, %c32_i32, %c0_i32_17 : i32
    %c1_i32_18 = arith.constant 1 : i32
    %68 = arith.select %67, %c1_i32_18, %c32_i32 : i32
    %69 = vector.broadcast %68 : i32 to vector<4x512xi32>
    %70 = arith.remsi %5, %69 : vector<4x512xi32>
    %c0_i32_19 = arith.constant 0 : i32
    %71 = vector.broadcast %c0_i32_19 : i32 to vector<4x512xi32>
    %72 = arith.cmpi ne, %70, %71 : vector<4x512xi32>
    %c0_i32_20 = arith.constant 0 : i32
    %73 = vector.broadcast %c0_i32_20 : i32 to vector<4x512xi32>
    %74 = arith.cmpi slt, %70, %73 : vector<4x512xi32>
    %c0_i32_21 = arith.constant 0 : i32
    %75 = arith.cmpi slt, %68, %c0_i32_21 : i32
    %76 = vector.broadcast %75 : i1 to vector<4x512xi1>
    %77 = vector.broadcast %76 : vector<4x512xi1> to vector<4x512xi1>
    %78 = arith.xori %74, %77 : vector<4x512xi1>
    %79 = arith.andi %78, %72 : vector<4x512xi1>
    %80 = vector.broadcast %68 : i32 to vector<4x512xi32>
    %81 = arith.addi %70, %80 : vector<4x512xi32>
    %82 = arith.select %79, %81, %70 : vector<4x512xi1>, vector<4x512xi32>
    %c8_i32_22 = arith.constant 8 : i32
    %83 = vector.broadcast %c8_i32_22 : i32 to vector<4x512xi32>
    %84 = arith.cmpi sge, %82, %83 : vector<4x512xi32>
    %85 = arith.select %84, %66, %65 : vector<4x512xi1>, vector<4x512xf32>
    %c496_i32_23 = arith.constant 496 : i32
    %86 = tpu.dynamic_rotate %85 by %c496_i32_23 dim 1 : vector<4x512xf32>, i32 -> vector<4x512xf32>
    %c64_i32 = arith.constant 64 : i32
    %c0_i32_24 = arith.constant 0 : i32
    %87 = arith.cmpi eq, %c64_i32, %c0_i32_24 : i32
    %c1_i32_25 = arith.constant 1 : i32
    %88 = arith.select %87, %c1_i32_25, %c64_i32 : i32
    %89 = vector.broadcast %88 : i32 to vector<4x512xi32>
    %90 = arith.remsi %5, %89 : vector<4x512xi32>
    %c0_i32_26 = arith.constant 0 : i32
    %91 = vector.broadcast %c0_i32_26 : i32 to vector<4x512xi32>
    %92 = arith.cmpi ne, %90, %91 : vector<4x512xi32>
    %c0_i32_27 = arith.constant 0 : i32
    %93 = vector.broadcast %c0_i32_27 : i32 to vector<4x512xi32>
    %94 = arith.cmpi slt, %90, %93 : vector<4x512xi32>
    %c0_i32_28 = arith.constant 0 : i32
    %95 = arith.cmpi slt, %88, %c0_i32_28 : i32
    %96 = vector.broadcast %95 : i1 to vector<4x512xi1>
    %97 = vector.broadcast %96 : vector<4x512xi1> to vector<4x512xi1>
    %98 = arith.xori %94, %97 : vector<4x512xi1>
    %99 = arith.andi %98, %92 : vector<4x512xi1>
    %100 = vector.broadcast %88 : i32 to vector<4x512xi32>
    %101 = arith.addi %90, %100 : vector<4x512xi32>
    %102 = arith.select %99, %101, %90 : vector<4x512xi1>, vector<4x512xi32>
    %c16_i32_29 = arith.constant 16 : i32
    %103 = vector.broadcast %c16_i32_29 : i32 to vector<4x512xi32>
    %104 = arith.cmpi sge, %102, %103 : vector<4x512xi32>
    %105 = arith.select %104, %86, %85 : vector<4x512xi1>, vector<4x512xf32>
    %c480_i32 = arith.constant 480 : i32
    %106 = tpu.dynamic_rotate %105 by %c480_i32 dim 1 : vector<4x512xf32>, i32 -> vector<4x512xf32>
    %c128_i32 = arith.constant 128 : i32
    %c0_i32_30 = arith.constant 0 : i32
    %107 = arith.cmpi eq, %c128_i32, %c0_i32_30 : i32
    %c1_i32_31 = arith.constant 1 : i32
    %108 = arith.select %107, %c1_i32_31, %c128_i32 : i32
    %109 = vector.broadcast %108 : i32 to vector<4x512xi32>
    %110 = arith.remsi %5, %109 : vector<4x512xi32>
    %c0_i32_32 = arith.constant 0 : i32
    %111 = vector.broadcast %c0_i32_32 : i32 to vector<4x512xi32>
    %112 = arith.cmpi ne, %110, %111 : vector<4x512xi32>
    %c0_i32_33 = arith.constant 0 : i32
    %113 = vector.broadcast %c0_i32_33 : i32 to vector<4x512xi32>
    %114 = arith.cmpi slt, %110, %113 : vector<4x512xi32>
    %c0_i32_34 = arith.constant 0 : i32
    %115 = arith.cmpi slt, %108, %c0_i32_34 : i32
    %116 = vector.broadcast %115 : i1 to vector<4x512xi1>
    %117 = vector.broadcast %116 : vector<4x512xi1> to vector<4x512xi1>
    %118 = arith.xori %114, %117 : vector<4x512xi1>
    %119 = arith.andi %118, %112 : vector<4x512xi1>
    %120 = vector.broadcast %108 : i32 to vector<4x512xi32>
    %121 = arith.addi %110, %120 : vector<4x512xi32>
    %122 = arith.select %119, %121, %110 : vector<4x512xi1>, vector<4x512xi32>
    %c32_i32_35 = arith.constant 32 : i32
    %123 = vector.broadcast %c32_i32_35 : i32 to vector<4x512xi32>
    %124 = arith.cmpi sge, %122, %123 : vector<4x512xi32>
    %125 = arith.select %124, %106, %105 : vector<4x512xi1>, vector<4x512xf32>
    %c448_i32 = arith.constant 448 : i32
    %126 = tpu.dynamic_rotate %125 by %c448_i32 dim 1 : vector<4x512xf32>, i32 -> vector<4x512xf32>
    %c256_i32 = arith.constant 256 : i32
    %c0_i32_36 = arith.constant 0 : i32
    %127 = arith.cmpi eq, %c256_i32, %c0_i32_36 : i32
    %c1_i32_37 = arith.constant 1 : i32
    %128 = arith.select %127, %c1_i32_37, %c256_i32 : i32
    %129 = vector.broadcast %128 : i32 to vector<4x512xi32>
    %130 = arith.remsi %5, %129 : vector<4x512xi32>
    %c0_i32_38 = arith.constant 0 : i32
    %131 = vector.broadcast %c0_i32_38 : i32 to vector<4x512xi32>
    %132 = arith.cmpi ne, %130, %131 : vector<4x512xi32>
    %c0_i32_39 = arith.constant 0 : i32
    %133 = vector.broadcast %c0_i32_39 : i32 to vector<4x512xi32>
    %134 = arith.cmpi slt, %130, %133 : vector<4x512xi32>
    %c0_i32_40 = arith.constant 0 : i32
    %135 = arith.cmpi slt, %128, %c0_i32_40 : i32
    %136 = vector.broadcast %135 : i1 to vector<4x512xi1>
    %137 = vector.broadcast %136 : vector<4x512xi1> to vector<4x512xi1>
    %138 = arith.xori %134, %137 : vector<4x512xi1>
    %139 = arith.andi %138, %132 : vector<4x512xi1>
    %140 = vector.broadcast %128 : i32 to vector<4x512xi32>
    %141 = arith.addi %130, %140 : vector<4x512xi32>
    %142 = arith.select %139, %141, %130 : vector<4x512xi1>, vector<4x512xi32>
    %c64_i32_41 = arith.constant 64 : i32
    %143 = vector.broadcast %c64_i32_41 : i32 to vector<4x512xi32>
    %144 = arith.cmpi sge, %142, %143 : vector<4x512xi32>
    %145 = arith.select %144, %126, %125 : vector<4x512xi1>, vector<4x512xf32>
    %c384_i32 = arith.constant 384 : i32
    %146 = tpu.dynamic_rotate %145 by %c384_i32 dim 1 : vector<4x512xf32>, i32 -> vector<4x512xf32>
    %c512_i32 = arith.constant 512 : i32
    %c0_i32_42 = arith.constant 0 : i32
    %147 = arith.cmpi eq, %c512_i32, %c0_i32_42 : i32
    %c1_i32_43 = arith.constant 1 : i32
    %148 = arith.select %147, %c1_i32_43, %c512_i32 : i32
    %149 = vector.broadcast %148 : i32 to vector<4x512xi32>
    %150 = arith.remsi %5, %149 : vector<4x512xi32>
    %c0_i32_44 = arith.constant 0 : i32
    %151 = vector.broadcast %c0_i32_44 : i32 to vector<4x512xi32>
    %152 = arith.cmpi ne, %150, %151 : vector<4x512xi32>
    %c0_i32_45 = arith.constant 0 : i32
    %153 = vector.broadcast %c0_i32_45 : i32 to vector<4x512xi32>
    %154 = arith.cmpi slt, %150, %153 : vector<4x512xi32>
    %c0_i32_46 = arith.constant 0 : i32
    %155 = arith.cmpi slt, %148, %c0_i32_46 : i32
    %156 = vector.broadcast %155 : i1 to vector<4x512xi1>
    %157 = vector.broadcast %156 : vector<4x512xi1> to vector<4x512xi1>
    %158 = arith.xori %154, %157 : vector<4x512xi1>
    %159 = arith.andi %158, %152 : vector<4x512xi1>
    %160 = vector.broadcast %148 : i32 to vector<4x512xi32>
    %161 = arith.addi %150, %160 : vector<4x512xi32>
    %162 = arith.select %159, %161, %150 : vector<4x512xi1>, vector<4x512xi32>
    %c128_i32_47 = arith.constant 128 : i32
    %163 = vector.broadcast %c128_i32_47 : i32 to vector<4x512xi32>
    %164 = arith.cmpi sge, %162, %163 : vector<4x512xi32>
    %165 = arith.select %164, %146, %145 : vector<4x512xi1>, vector<4x512xf32>
    %c504_i32_48 = arith.constant 504 : i32
    %166 = tpu.dynamic_rotate %165 by %c504_i32_48 dim 1 : vector<4x512xf32>, i32 -> vector<4x512xf32>
    %c32_i32_49 = arith.constant 32 : i32
    %c0_i32_50 = arith.constant 0 : i32
    %167 = arith.cmpi eq, %c32_i32_49, %c0_i32_50 : i32
    %c1_i32_51 = arith.constant 1 : i32
    %168 = arith.select %167, %c1_i32_51, %c32_i32_49 : i32
    %169 = vector.broadcast %168 : i32 to vector<4x512xi32>
    %170 = arith.remsi %5, %169 : vector<4x512xi32>
    %c0_i32_52 = arith.constant 0 : i32
    %171 = vector.broadcast %c0_i32_52 : i32 to vector<4x512xi32>
    %172 = arith.cmpi ne, %170, %171 : vector<4x512xi32>
    %c0_i32_53 = arith.constant 0 : i32
    %173 = vector.broadcast %c0_i32_53 : i32 to vector<4x512xi32>
    %174 = arith.cmpi slt, %170, %173 : vector<4x512xi32>
    %c0_i32_54 = arith.constant 0 : i32
    %175 = arith.cmpi slt, %168, %c0_i32_54 : i32
    %176 = vector.broadcast %175 : i1 to vector<4x512xi1>
    %177 = vector.broadcast %176 : vector<4x512xi1> to vector<4x512xi1>
    %178 = arith.xori %174, %177 : vector<4x512xi1>
    %179 = arith.andi %178, %172 : vector<4x512xi1>
    %180 = vector.broadcast %168 : i32 to vector<4x512xi32>
    %181 = arith.addi %170, %180 : vector<4x512xi32>
    %182 = arith.select %179, %181, %170 : vector<4x512xi1>, vector<4x512xi32>
    %c8_i32_55 = arith.constant 8 : i32
    %183 = vector.broadcast %c8_i32_55 : i32 to vector<4x512xi32>
    %184 = arith.cmpi sge, %182, %183 : vector<4x512xi32>
    %185 = arith.select %184, %166, %165 : vector<4x512xi1>, vector<4x512xf32>
    %c496_i32_56 = arith.constant 496 : i32
    %186 = tpu.dynamic_rotate %185 by %c496_i32_56 dim 1 : vector<4x512xf32>, i32 -> vector<4x512xf32>
    %c64_i32_57 = arith.constant 64 : i32
    %c0_i32_58 = arith.constant 0 : i32
    %187 = arith.cmpi eq, %c64_i32_57, %c0_i32_58 : i32
    %c1_i32_59 = arith.constant 1 : i32
    %188 = arith.select %187, %c1_i32_59, %c64_i32_57 : i32
    %189 = vector.broadcast %188 : i32 to vector<4x512xi32>
    %190 = arith.remsi %5, %189 : vector<4x512xi32>
    %c0_i32_60 = arith.constant 0 : i32
    %191 = vector.broadcast %c0_i32_60 : i32 to vector<4x512xi32>
    %192 = arith.cmpi ne, %190, %191 : vector<4x512xi32>
    %c0_i32_61 = arith.constant 0 : i32
    %193 = vector.broadcast %c0_i32_61 : i32 to vector<4x512xi32>
    %194 = arith.cmpi slt, %190, %193 : vector<4x512xi32>
    %c0_i32_62 = arith.constant 0 : i32
    %195 = arith.cmpi slt, %188, %c0_i32_62 : i32
    %196 = vector.broadcast %195 : i1 to vector<4x512xi1>
    %197 = vector.broadcast %196 : vector<4x512xi1> to vector<4x512xi1>
    %198 = arith.xori %194, %197 : vector<4x512xi1>
    %199 = arith.andi %198, %192 : vector<4x512xi1>
    %200 = vector.broadcast %188 : i32 to vector<4x512xi32>
    %201 = arith.addi %190, %200 : vector<4x512xi32>
    %202 = arith.select %199, %201, %190 : vector<4x512xi1>, vector<4x512xi32>
    %c16_i32_63 = arith.constant 16 : i32
    %203 = vector.broadcast %c16_i32_63 : i32 to vector<4x512xi32>
    %204 = arith.cmpi sge, %202, %203 : vector<4x512xi32>
    %205 = arith.select %204, %186, %185 : vector<4x512xi1>, vector<4x512xf32>
    %c480_i32_64 = arith.constant 480 : i32
    %206 = tpu.dynamic_rotate %205 by %c480_i32_64 dim 1 : vector<4x512xf32>, i32 -> vector<4x512xf32>
    %c128_i32_65 = arith.constant 128 : i32
    %c0_i32_66 = arith.constant 0 : i32
    %207 = arith.cmpi eq, %c128_i32_65, %c0_i32_66 : i32
    %c1_i32_67 = arith.constant 1 : i32
    %208 = arith.select %207, %c1_i32_67, %c128_i32_65 : i32
    %209 = vector.broadcast %208 : i32 to vector<4x512xi32>
    %210 = arith.remsi %5, %209 : vector<4x512xi32>
    %c0_i32_68 = arith.constant 0 : i32
    %211 = vector.broadcast %c0_i32_68 : i32 to vector<4x512xi32>
    %212 = arith.cmpi ne, %210, %211 : vector<4x512xi32>
    %c0_i32_69 = arith.constant 0 : i32
    %213 = vector.broadcast %c0_i32_69 : i32 to vector<4x512xi32>
    %214 = arith.cmpi slt, %210, %213 : vector<4x512xi32>
    %c0_i32_70 = arith.constant 0 : i32
    %215 = arith.cmpi slt, %208, %c0_i32_70 : i32
    %216 = vector.broadcast %215 : i1 to vector<4x512xi1>
    %217 = vector.broadcast %216 : vector<4x512xi1> to vector<4x512xi1>
    %218 = arith.xori %214, %217 : vector<4x512xi1>
    %219 = arith.andi %218, %212 : vector<4x512xi1>
    %220 = vector.broadcast %208 : i32 to vector<4x512xi32>
    %221 = arith.addi %210, %220 : vector<4x512xi32>
    %222 = arith.select %219, %221, %210 : vector<4x512xi1>, vector<4x512xi32>
    %c32_i32_71 = arith.constant 32 : i32
    %223 = vector.broadcast %c32_i32_71 : i32 to vector<4x512xi32>
    %224 = arith.cmpi sge, %222, %223 : vector<4x512xi32>
    %225 = arith.select %224, %206, %205 : vector<4x512xi1>, vector<4x512xf32>
    %c448_i32_72 = arith.constant 448 : i32
    %226 = tpu.dynamic_rotate %225 by %c448_i32_72 dim 1 : vector<4x512xf32>, i32 -> vector<4x512xf32>
    %c256_i32_73 = arith.constant 256 : i32
    %c0_i32_74 = arith.constant 0 : i32
    %227 = arith.cmpi eq, %c256_i32_73, %c0_i32_74 : i32
    %c1_i32_75 = arith.constant 1 : i32
    %228 = arith.select %227, %c1_i32_75, %c256_i32_73 : i32
    %229 = vector.broadcast %228 : i32 to vector<4x512xi32>
    %230 = arith.remsi %5, %229 : vector<4x512xi32>
    %c0_i32_76 = arith.constant 0 : i32
    %231 = vector.broadcast %c0_i32_76 : i32 to vector<4x512xi32>
    %232 = arith.cmpi ne, %230, %231 : vector<4x512xi32>
    %c0_i32_77 = arith.constant 0 : i32
    %233 = vector.broadcast %c0_i32_77 : i32 to vector<4x512xi32>
    %234 = arith.cmpi slt, %230, %233 : vector<4x512xi32>
    %c0_i32_78 = arith.constant 0 : i32
    %235 = arith.cmpi slt, %228, %c0_i32_78 : i32
    %236 = vector.broadcast %235 : i1 to vector<4x512xi1>
    %237 = vector.broadcast %236 : vector<4x512xi1> to vector<4x512xi1>
    %238 = arith.xori %234, %237 : vector<4x512xi1>
    %239 = arith.andi %238, %232 : vector<4x512xi1>
    %240 = vector.broadcast %228 : i32 to vector<4x512xi32>
    %241 = arith.addi %230, %240 : vector<4x512xi32>
    %242 = arith.select %239, %241, %230 : vector<4x512xi1>, vector<4x512xi32>
    %c64_i32_79 = arith.constant 64 : i32
    %243 = vector.broadcast %c64_i32_79 : i32 to vector<4x512xi32>
    %244 = arith.cmpi sge, %242, %243 : vector<4x512xi32>
    %245 = arith.select %244, %226, %225 : vector<4x512xi1>, vector<4x512xf32>
    %c384_i32_80 = arith.constant 384 : i32
    %246 = tpu.dynamic_rotate %245 by %c384_i32_80 dim 1 : vector<4x512xf32>, i32 -> vector<4x512xf32>
    %c512_i32_81 = arith.constant 512 : i32
    %c0_i32_82 = arith.constant 0 : i32
    %247 = arith.cmpi eq, %c512_i32_81, %c0_i32_82 : i32
    %c1_i32_83 = arith.constant 1 : i32
    %248 = arith.select %247, %c1_i32_83, %c512_i32_81 : i32
    %249 = vector.broadcast %248 : i32 to vector<4x512xi32>
    %250 = arith.remsi %5, %249 : vector<4x512xi32>
    %c0_i32_84 = arith.constant 0 : i32
    %251 = vector.broadcast %c0_i32_84 : i32 to vector<4x512xi32>
    %252 = arith.cmpi ne, %250, %251 : vector<4x512xi32>
    %c0_i32_85 = arith.constant 0 : i32
    %253 = vector.broadcast %c0_i32_85 : i32 to vector<4x512xi32>
    %254 = arith.cmpi slt, %250, %253 : vector<4x512xi32>
    %c0_i32_86 = arith.constant 0 : i32
    %255 = arith.cmpi slt, %248, %c0_i32_86 : i32
    %256 = vector.broadcast %255 : i1 to vector<4x512xi1>
    %257 = vector.broadcast %256 : vector<4x512xi1> to vector<4x512xi1>
    %258 = arith.xori %254, %257 : vector<4x512xi1>
    %259 = arith.andi %258, %252 : vector<4x512xi1>
    %260 = vector.broadcast %248 : i32 to vector<4x512xi32>
    %261 = arith.addi %250, %260 : vector<4x512xi32>
    %262 = arith.select %259, %261, %250 : vector<4x512xi1>, vector<4x512xi32>
    %c128_i32_87 = arith.constant 128 : i32
    %263 = vector.broadcast %c128_i32_87 : i32 to vector<4x512xi32>
    %264 = arith.cmpi sge, %262, %263 : vector<4x512xi32>
    %265 = arith.select %264, %246, %245 : vector<4x512xi1>, vector<4x512xf32>
    %266 = vector.extract_strided_slice %265 {offsets = [0, 0], sizes = [4, 128], strides = [1, 1]} : vector<4x512xf32> to vector<4x128xf32>
    %c0_88 = arith.constant 0 : index
    %c0_89 = arith.constant 0 : index
    %267 = vector.load %arg2[%c0_88, %c0_89] : memref<4x128xf32, #tpu.memory_space<vmem>>, vector<4x128xf32>
    tpu.vector_store %arg2[%c0_88, %c0_89], %266 {strides = array<i32>} : memref<4x128xf32, #tpu.memory_space<vmem>>, vector<4x128xf32>,
    return
  }
  func.func @transform_0(%arg0: i32) -> (i32, i32) {
    %c0_i32 = arith.constant 0 : i32
    %c0_i32_0 = arith.constant 0 : i32
    return %arg0, %c0_i32 : i32, i32
  }
  func.func @transform_1(%arg0: i32) -> (i32, i32) {
    %c0_i32 = arith.constant 0 : i32
    %c0_i32_0 = arith.constant 0 : i32
    return %arg0, %c0_i32 : i32, i32
  }
}

</mosaic_0001>

<bundles_post_ra>
// kernel: maxpool2d_2x2.1
= control target key start
LH: loop header
LB: loop body
LE: loop exit
PB: predicated region body
PF: predicated region fallthrough
CT: control target
= control target key end

     0   :  { %s687_s10 = smov 112   ;;  %v24_v4 = vlaneseq  ;;  %s689_s11 = smov 126   ;;  %s956_s0 = inlined_call_operand.vmem [shape: f32[4,512], index: 0, kind: input, shape index: {}]   ;;  %s957_s1 = inlined_call_operand.vmem [shape: f32[4,128], index: 1, kind: output, shape index: {}]  }
   0x1   :  { %v9_v0 = vld [vmem:[%s956_s0 + $0x8] sm:$0xff]  ;;  %v8_v1 = vld [vmem:[%s956_s0] sm:$0xff]  ;;  %s688_s0 = smov 127   ;;  %s690_s12 = smov 124  }
   0x2   :  { %20 = vrot.lane.b32.xlu1 %v9_v0, %s687_s10  ;;  %16 = vrot.lane.b32.xlu0 %v8_v1, %s687_s10  ;;  %v13_v2 = vcombine.high %v9_v0, %v9_v0  ;;  %v12_v3 = vcombine.high %v8_v1, %v8_v1  ;;  %v714_v5 = vand.u32 127, %v24_v4  ;;  %s691_s13 = smov 120   ;;  %s692_s14 = smov 96  }
   0x3   :  { %s693_s15 = smov 64  }
   0x4   :  { %vm26_vm0 = vcmp.lt.s32.totalorder %v714_v5, 112  ;;  %vm55_vm1 = vcmp.lt.s32.totalorder %v714_v5, 127  ;;  %v735_v34 = vadd.s32 128, %v714_v5  ;;  %v95_v35 = vand.u32 3, %v714_v5 }
   0x5   :  { %v739_v36 = vadd.s32 256, %v714_v5  ;;  %v743_v38 = vadd.s32 384, %v714_v5  ;;  %v164_v53 = vand.u32 7, %v714_v5  ;;  %vm155_vm6 = vcmp.lt.s32.totalorder %v714_v5, 126 }
   0x6   :  { %22 = vrot.lane.b32.xlu1 %v13_v2, %s687_s10  ;;  %18 = vrot.lane.b32.xlu0 %v12_v3, %s687_s10  ;;  %v102_v37 = vand.u32 3, %v735_v34  ;;  %vm139_vm2 = vcmp.ge.s32.totalorder %v95_v35, 1  ;;  %v171_v54 = vand.u32 7, %v735_v34  ;;  %vm224_vm11 = vcmp.lt.s32.totalorder %v714_v5, 124 }
   0x7   :  { %v109_v40 = vand.u32 3, %v739_v36  ;;  %v116_v43 = vand.u32 3, %v743_v38  ;;  %vm208_vm7 = vcmp.ge.s32.totalorder %v164_v53, 2  ;;  %v178_v56 = vand.u32 7, %v739_v36 }
   0x8   :  { %vm140_vm3 = vcmp.ge.s32.totalorder %v102_v37, 1  ;;  %vm209_vm8 = vcmp.ge.s32.totalorder %v171_v54, 2  ;;  %v185_v59 = vand.u32 7, %v743_v38  ;;  %v391_v53 = vand.u32 63, %v743_v38 }
   0x9   :  { %vm141_vm4 = vcmp.ge.s32.totalorder %v109_v40, 1  ;;  %vm142_vm5 = vcmp.ge.s32.totalorder %v116_v43, 1  ;;  %vm210_vm9 = vcmp.ge.s32.totalorder %v178_v56, 2 }
   0xa   :  { %vm211_vm10 = vcmp.ge.s32.totalorder %v185_v59, 2 }
  0x74   :  { %v21_v6 = vpop.permute.xlu1 %20  ;;  %v17_v7 = vpop.permute.xlu0 %16 }
  0x78   :  { %v23_v8 = vpop.permute.xlu1 %22  ;;  %v19_v9 = vpop.permute.xlu0 %18 }
  0x79   :  { %v27_v10 = vsel %vm26_vm0, %v21_v6, %v23_v8  ;;  %v30_v11 = vsel %vm26_vm0, %v23_v8, %v17_v7  ;;  %v28_v12 = vsel %vm26_vm0, %v19_v9, %v21_v6  ;;  %v29_v13 = vsel %vm26_vm0, %v17_v7, %v19_v9 }
  0x7a   :  { %v36_v14 = vcombine.low %v27_v10, %v30_v11  ;;  %v35_v15 = vcombine.low %v29_v13, %v28_v12  ;;  %v233_v6 = vand.u32 15, %v714_v5  ;;  %v240_v7 = vand.u32 15, %v735_v34 }
  0x7b   :  { %v247_v9 = vand.u32 15, %v739_v36  ;;  %v254_v12 = vand.u32 15, %v743_v38 }
  0x7c   :  { %v39_v16 = vmax.f32 %v8_v1, %v35_v15  ;;  %v40_v18 = vmax.f32 %v9_v0, %v36_v14  ;;  %vm277_vm12 = vcmp.ge.s32.totalorder %v233_v6, 4  ;;  %vm278_vm13 = vcmp.ge.s32.totalorder %v240_v7, 4 }
  0x7d   :  { %vm279_vm14 = vcmp.ge.s32.totalorder %v247_v9, 4  ;;  %vm280_vm15 = vcmp.ge.s32.totalorder %v254_v12, 4  ;;  %v460_v7 = vand.u32 127, %v743_v38 }
  0x7e   :  { %47 = vrot.lane.b32.xlu0 %v39_v16, %s688_s0  ;;  %v43_v17 = vcombine.high %v39_v16, %v39_v16  ;;  %v44_v19 = vcombine.high %v40_v18, %v40_v18 }
  0x80   :  { %49 = vrot.lane.b32.xlu1 %v43_v17, %s688_s0 }
  0x82   :  { %51 = vrot.lane.b32.xlu0 %v40_v18, %s688_s0 }
  0x84   :  { %53 = vrot.lane.b32.xlu1 %v44_v19, %s688_s0 }
  0xf0   :  { %v48_v20 = vpop.permute.xlu0 %47 }
  0xf2   :  { %v50_v21 = vpop.permute.xlu1 %49 }
  0xf3   :  { %v58_v23 = vsel %vm55_vm1, %v48_v20, %v50_v21 }
  0xf4   :  { %v52_v22 = vpop.permute.xlu0 %51 }
  0xf5   :  { %v57_v24 = vsel %vm55_vm1, %v50_v21, %v52_v22 }
  0xf6   :  { %v64_v25 = vcombine.low %v58_v23, %v57_v24  ;;  %v54_v26 = vpop.permute.xlu1 %53  ;;  %v309_v23 = vand.u32 31, %v735_v34 }
  0xf7   :  { %v56_v27 = vsel %vm55_vm1, %v52_v22, %v54_v26  ;;  %v59_v28 = vsel %vm55_vm1, %v54_v26, %v48_v20  ;;  %v302_v22 = vand.u32 31, %v714_v5  ;;  %v316_v26 = vand.u32 31, %v739_v36 }
  0xf8   :  { %v65_v29 = vcombine.low %v56_v27, %v59_v28  ;;  %v68_v30 = vmax.f32 %v39_v16, %v64_v25 }
  0xfa   :  { %79 = vrot.lane.b32.xlu0 %v68_v30, %s688_s0  ;;  %v75_v31 = vcombine.high %v68_v30, %v68_v30  ;;  %v69_v32 = vmax.f32 %v40_v18, %v65_v29 }
  0xfc   :  { %81 = vrot.lane.b32.xlu1 %v75_v31, %s688_s0  ;;  %v76_v33 = vcombine.high %v69_v32, %v69_v32 }
  0xfe   :  { %83 = vrot.lane.b32.xlu0 %v69_v32, %s688_s0 }
 0x100   :  { %85 = vrot.lane.b32.xlu1 %v76_v33, %s688_s0 }
 0x16c   :  { %v80_v39 = vpop.permute.xlu0 %79 }
 0x16e   :  { %v82_v41 = vpop.permute.xlu1 %81 }
 0x16f   :  { %v89_v42 = vsel %vm55_vm1, %v80_v39, %v82_v41 }
 0x170   :  { %v84_v44 = vpop.permute.xlu0 %83  ;;  %v143_v45 = vsel %vm139_vm2, %v89_v42, %v68_v30  ;;  %vm788_vm2 = vcmp.ge.s32.totalorder %v302_v22, 8  ;;  %v323_v30 = vand.u32 31, %v743_v38 }
 0x171   :  { %v88_v46 = vsel %vm55_vm1, %v82_v41, %v84_v44  ;;  %147 = vrot.lane.b32.xlu0 %v143_v45, %s689_s11 }
 0x172   :  { %v86_v47 = vpop.permute.xlu1 %85  ;;  %v144_v48 = vsel %vm140_vm3, %v88_v46, %v75_v31  ;;  %vm795_vm3 = vcmp.ge.s32.totalorder %v309_v23, 8  ;;  %v377_v46 = vand.u32 63, %v735_v34 }
 0x173   :  { %v87_v49 = vsel %vm55_vm1, %v84_v44, %v86_v47  ;;  %v90_v50 = vsel %vm55_vm1, %v86_v47, %v80_v39  ;;  %149 = vrot.lane.b32.xlu1 %v144_v48, %s689_s11  ;;  %vm293_vm1 = vcmp.lt.s32.totalorder %v714_v5, 120 }
 0x174   :  { %v145_v51 = vsel %vm141_vm4, %v87_v49, %v69_v32  ;;  %v146_v52 = vsel %vm142_vm5, %v90_v50, %v76_v33  ;;  %vm805_vm4 = vcmp.ge.s32.totalorder %v316_v26, 8  ;;  %vm816_vm5 = vcmp.ge.s32.totalorder %v323_v30, 8 }
 0x175   :  { %151 = vrot.lane.b32.xlu0 %v145_v51, %s689_s11  ;;  %v384_v49 = vand.u32 63, %v739_v36 }
 0x177   :  { %153 = vrot.lane.b32.xlu1 %v146_v52, %s689_s11 }
 0x1e3   :  { %v148_v55 = vpop.permute.xlu0 %147 }
 0x1e5   :  { %v150_v57 = vpop.permute.xlu1 %149 }
 0x1e6   :  { %v158_v58 = vsel %vm155_vm6, %v148_v55, %v150_v57 }
 0x1e7   :  { %v152_v60 = vpop.permute.xlu0 %151  ;;  %v212_v61 = vsel %vm208_vm7, %v158_v58, %v143_v45  ;;  %v370_v45 = vand.u32 63, %v714_v5  ;;  %vm835_vm7 = vcmp.ge.s32.totalorder %v377_v46, 16 }
 0x1e8   :  { %v157_v62 = vsel %vm155_vm6, %v150_v57, %v152_v60  ;;  %216 = vrot.lane.b32.xlu0 %v212_v61, %s690_s12 }
 0x1e9   :  { %v154_v63 = vpop.permute.xlu1 %153  ;;  %v213_v0 = vsel %vm209_vm8, %v157_v62, %v144_v48  ;;  %vm845_vm8 = vcmp.ge.s32.totalorder %v384_v49, 16 }
 0x1ea   :  { %v156_v1 = vsel %vm155_vm6, %v152_v60, %v154_v63  ;;  %v159_v2 = vsel %vm155_vm6, %v154_v63, %v148_v55  ;;  %218 = vrot.lane.b32.xlu1 %v213_v0, %s690_s12  ;;  %vm828_vm6 = vcmp.ge.s32.totalorder %v370_v45, 16 }
 0x1eb   :  { %v214_v3 = vsel %vm210_vm9, %v156_v1, %v145_v51  ;;  %v215_v4 = vsel %vm211_vm10, %v159_v2, %v146_v52  ;;  %vm417_vm9 = vcmp.ge.s32.totalorder %v391_v53, 16  ;;  %vm430_vm10 = vcmp.lt.s32.totalorder %v714_v5, 96 }
 0x1ec   :  { %220 = vrot.lane.b32.xlu0 %v214_v3, %s690_s12  ;;  %v453_v2 = vand.u32 127, %v739_v36 }
 0x1ee   :  { %222 = vrot.lane.b32.xlu1 %v215_v4, %s690_s12 }
 0x25a   :  { %v217_v8 = vpop.permute.xlu0 %216 }
 0x25c   :  { %v219_v10 = vpop.permute.xlu1 %218 }
 0x25d   :  { %v227_v11 = vsel %vm224_vm11, %v217_v8, %v219_v10 }
 0x25e   :  { %v221_v13 = vpop.permute.xlu0 %220  ;;  %v281_v14 = vsel %vm277_vm12, %v227_v11, %v212_v61 }
 0x25f   :  { %v226_v15 = vsel %vm224_vm11, %v219_v10, %v221_v13  ;;  %285 = vrot.lane.b32.xlu0 %v281_v14, %s691_s13 }
 0x260   :  { %v223_v16 = vpop.permute.xlu1 %222  ;;  %v282_v17 = vsel %vm278_vm13, %v226_v15, %v213_v0  ;;  %v446_v0 = vand.u32 127, %v735_v34  ;;  %vm485_vm13 = vcmp.ge.s32.totalorder %v453_v2, 32  ;;  %v508_v15 = vand.u32 255, %v714_v5 }
 0x261   :  { %v225_v18 = vsel %vm224_vm11, %v221_v13, %v223_v16  ;;  %v228_v19 = vsel %vm224_vm11, %v223_v16, %v217_v8  ;;  %287 = vrot.lane.b32.xlu1 %v282_v17, %s691_s13  ;;  %vm483_vm11 = vcmp.ge.s32.totalorder %v714_v5, 32 }
 0x262   :  { %v283_v20 = vsel %vm279_vm14, %v225_v18, %v214_v3  ;;  %v284_v21 = vsel %vm280_vm15, %v228_v19, %v215_v4  ;;  %vm866_vm12 = vcmp.ge.s32.totalorder %v446_v0, 32  ;;  %vm486_vm14 = vcmp.ge.s32.totalorder %v460_v7, 32 }
 0x263   :  { %289 = vrot.lane.b32.xlu0 %v283_v20, %s691_s13  ;;  %vm499_vm15 = vcmp.lt.s32.totalorder %v714_v5, 64  ;;  %v522_v18 = vand.u32 255, %v739_v36 }
 0x265   :  { %291 = vrot.lane.b32.xlu1 %v284_v21, %s691_s13 }
 0x2d1   :  { %v286_v24 = vpop.permute.xlu0 %285 }
 0x2d3   :  { %v288_v27 = vpop.permute.xlu1 %287 }
 0x2d4   :  { %v296_v28 = vsel %vm293_vm1, %v286_v24, %v288_v27 }
 0x2d5   :  { %v290_v31 = vpop.permute.xlu0 %289  ;;  %v350_v32 = vsel %vm788_vm2, %v296_v28, %v281_v14 }
 0x2d6   :  { %v295_v33 = vsel %vm293_vm1, %v288_v27, %v290_v31  ;;  %354 = vrot.lane.b32.xlu0 %v350_v32, %s687_s10 }
 0x2d7   :  { %v292_v37 = vpop.permute.xlu1 %291  ;;  %v351_v39 = vsel %vm795_vm3, %v295_v33, %v282_v17 }
 0x2d8   :  { %v294_v40 = vsel %vm293_vm1, %v290_v31, %v292_v37  ;;  %v297_v41 = vsel %vm293_vm1, %v292_v37, %v286_v24  ;;  %356 = vrot.lane.b32.xlu1 %v351_v39, %s687_s10 }
 0x2d9   :  { %v352_v43 = vsel %vm805_vm4, %v294_v40, %v283_v20  ;;  %v353_v44 = vsel %vm816_vm5, %v297_v41, %v284_v21 }
 0x2da   :  { %358 = vrot.lane.b32.xlu0 %v352_v43, %s687_s10 }
 0x2dc   :  { %360 = vrot.lane.b32.xlu1 %v353_v44, %s687_s10 }
 0x348   :  { %v355_v47 = vpop.permute.xlu0 %354 }
 0x34a   :  { %v357_v50 = vpop.permute.xlu1 %356 }
 0x34b   :  { %v364_v51 = vsel %vm26_vm0, %v355_v47, %v357_v50 }
 0x34c   :  { %v359_v54 = vpop.permute.xlu0 %358  ;;  %v418_v55 = vsel %vm828_vm6, %v364_v51, %v350_v32 }
 0x34d   :  { %v363_v56 = vsel %vm26_vm0, %v357_v50, %v359_v54  ;;  %422 = vrot.lane.b32.xlu0 %v418_v55, %s692_s14 }
 0x34e   :  { %v361_v58 = vpop.permute.xlu1 %360  ;;  %v419_v59 = vsel %vm835_vm7, %v363_v56, %v351_v39 }
 0x34f   :  { %v362_v60 = vsel %vm26_vm0, %v359_v54, %v361_v58  ;;  %v365_v61 = vsel %vm26_vm0, %v361_v58, %v355_v47  ;;  %424 = vrot.lane.b32.xlu1 %v419_v59, %s692_s14 }
 0x350   :  { %v420_v62 = vsel %vm845_vm8, %v362_v60, %v352_v43  ;;  %v421_v63 = vsel %vm417_vm9, %v365_v61, %v353_v44  ;;  %vm887_vm9 = vcmp.ge.s32.totalorder %v508_v15, 64 }
 0x351   :  { %426 = vrot.lane.b32.xlu0 %v420_v62, %s692_s14 }
 0x353   :  { %428 = vrot.lane.b32.xlu1 %v421_v63, %s692_s14 }
 0x3bf   :  { %v423_v1 = vpop.permute.xlu0 %422 }
 0x3c1   :  { %v425_v3 = vpop.permute.xlu1 %424 }
 0x3c2   :  { %v433_v4 = vsel %vm430_vm10, %v423_v1, %v425_v3 }
 0x3c3   :  { %v427_v8 = vpop.permute.xlu0 %426  ;;  %v487_v34 = vsel %vm483_vm11, %v433_v4, %v418_v55 }
 0x3c4   :  { %v432_v9 = vsel %vm430_vm10, %v425_v3, %v427_v8  ;;  %491 = vrot.lane.b32.xlu0 %v487_v34, %s693_s15 }
 0x3c5   :  { %v429_v10 = vpop.permute.xlu1 %428  ;;  %v488_v11 = vsel %vm866_vm12, %v432_v9, %v419_v59 }
 0x3c6   :  { %v431_v12 = vsel %vm430_vm10, %v427_v8, %v429_v10  ;;  %v434_v38 = vsel %vm430_vm10, %v429_v10, %v423_v1  ;;  %493 = vrot.lane.b32.xlu1 %v488_v11, %s693_s15 }
 0x3c7   :  { %v489_v13 = vsel %vm485_vm13, %v431_v12, %v420_v62  ;;  %v490_v14 = vsel %vm486_vm14, %v434_v38, %v421_v63  ;;  %vm554_vm13 = vcmp.ge.s32.totalorder %v522_v18, 64 }
 0x3c8   :  { %495 = vrot.lane.b32.xlu0 %v489_v13, %s693_s15 }
 0x3ca   :  { %497 = vrot.lane.b32.xlu1 %v490_v14, %s693_s15 }
 0x436   :  { %v492_v16 = vpop.permute.xlu0 %491 }
 0x438   :  { %v494_v19 = vpop.permute.xlu1 %493 }
 0x439   :  { %v502_v20 = vsel %vm499_vm15, %v492_v16, %v494_v19 }
 0x43a   :  { %v556_v21 = vsel %vm887_vm9, %v502_v20, %v487_v34  ;;  %v496_v22 = vpop.permute.xlu0 %495 }
 0x43b   :  { %616 = vrot.lane.b32.xlu0 %v556_v21, %s691_s13 }
 0x43c   :  { %v498_v23 = vpop.permute.xlu1 %497 }
 0x43d   :  { %v500_v24 = vsel %vm499_vm15, %v496_v22, %v498_v23  ;;  %v503_v26 = vsel %vm499_vm15, %v498_v23, %v492_v16 }
 0x43e   :  { %v558_v27 = vsel %vm554_vm13, %v500_v24, %v489_v13 }
 0x43f   :  { %620 = vrot.lane.b32.xlu0 %v503_v26, %s691_s13  ;;  %618 = vrot.lane.b32.xlu1 %v558_v27, %s691_s13 }
 0x443   :  { %622 = vrot.lane.b32.xlu1 %v556_v21, %s691_s13 }
 0x4ad   :  { %v617_v36 = vpop.permute.xlu0 %616 }
 0x4b1   :  { %v621_v28 = vpop.permute.xlu0 %620  ;;  %v619_v30 = vpop.permute.xlu1 %618 }
 0x4b2   :  { %v625_v31 = vsel %vm293_vm1, %v619_v30, %v621_v28  ;;  %v626_v32 = vsel %vm293_vm1, %v617_v36, %v619_v30 }
 0x4b3   :  { %v628_v33 = vsel %vm788_vm2, %v626_v32, %v556_v21  ;;  %v629_v37 = vsel %vm795_vm3, %v625_v31, %v558_v27 }
 0x4b4   :  { %632 = vrot.lane.b32.xlu0 %v628_v33, %s687_s10  ;;  %634 = vrot.lane.b32.xlu1 %v629_v37, %s687_s10 }
 0x4b5   :  { %v623_v39 = vpop.permute.xlu1 %622 }
 0x4b6   :  { %v624_v40 = vsel %vm293_vm1, %v621_v28, %v623_v39  ;;  %v627_v41 = vsel %vm293_vm1, %v623_v39, %v617_v36 }
 0x4b7   :  { %v631_v43 = vsel %vm816_vm5, %v627_v41, %v556_v21  ;;  %v630_v25 = vsel %vm805_vm4, %v624_v40, %v503_v26 }
 0x4b8   :  { %638 = vrot.lane.b32.xlu1 %v631_v43, %s687_s10  ;;  %636 = vrot.lane.b32.xlu0 %v630_v25, %s687_s10 }
 0x526   :  { %v633_v29 = vpop.permute.xlu0 %632  ;;  %v635_v44 = vpop.permute.xlu1 %634 }
 0x527   :  { %v642_v45 = vsel %vm26_vm0, %v633_v29, %v635_v44 }
 0x528   :  { %v644_v46 = vsel %vm828_vm6, %v642_v45, %v628_v33 }
 0x529   :  { %648 = vrot.lane.b32.xlu0 %v644_v46, %s692_s14 }
 0x52a   :  { %v637_v47 = vpop.permute.xlu0 %636  ;;  %v639_v42 = vpop.permute.xlu1 %638 }
 0x52b   :  { %v641_v35 = vsel %vm26_vm0, %v635_v44, %v637_v47  ;;  %v640_v49 = vsel %vm26_vm0, %v637_v47, %v639_v42 }
 0x52c   :  { %v645_v50 = vsel %vm835_vm7, %v641_v35, %v629_v37  ;;  %v646_v51 = vsel %vm845_vm8, %v640_v49, %v630_v25 }
 0x52d   :  { %650 = vrot.lane.b32.xlu1 %v645_v50, %s692_s14  ;;  %652 = vrot.lane.b32.xlu0 %v646_v51, %s692_s14 }
 0x59b   :  { %v649_v48 = vpop.permute.xlu0 %648 }
 0x59f   :  { %v653_v53 = vpop.permute.xlu0 %652  ;;  %v651_v54 = vpop.permute.xlu1 %650 }
 0x5a0   :  { %v657_v55 = vsel %vm430_vm10, %v651_v54, %v653_v53  ;;  %v658_v56 = vsel %vm430_vm10, %v649_v48, %v651_v54 }
 0x5a1   :  { %v659_v52 = vsel %vm483_vm11, %v658_v56, %v644_v46  ;;  %v660_v57 = vsel %vm866_vm12, %v657_v55, %v645_v50 }
 0x5a2   :  { %662 = vrot.lane.b32.xlu1 %v659_v52, %s693_s15  ;;  %664 = vrot.lane.b32.xlu0 %v660_v57, %s693_s15 }
 0x614   :  { %v663_v58 = vpop.permute.xlu1 %662  ;;  %v665_v59 = vpop.permute.xlu0 %664 }
 0x615   :  { %v669_v60 = vsel %vm499_vm15, %v663_v58, %v665_v59 }
 0x616   :  { %v670_v61 = vsel %vm887_vm9, %v669_v60, %v659_v52 }
 0x617   :  { %673 = vst [vmem:[%s957_s1] sm:$0xf] %v670_v61 }

</bundles_post_ra>
